<compile_context>
chip_gen: v6e
topology: v6e:2x2x1
jax: 0.10.0
libtpu: 0.0.40
codegen_flags: <defaults>
</compile_context>

<pallas_src>
import functools

import jax
import jax.numpy as jnp
from jax.experimental import pallas as pl
from jax.experimental.pallas import tpu as pltpu


def _net_kernel(x_ref,
                w1_ref, b1_ref,
                w2_ref, b2_ref,
                w3_ref, b3_ref,
                w4_ref, b4_ref,
                w5_ref, b5_ref,
                o_ref,
                *, compute_dtype):
    # x_ref: [3, TB]; weights in PyTorch [out, in] layout; biases [out, 1].
    x = x_ref[...]                      # [3, TB] f32
    w1 = w1_ref[...]                    # [50, 3]

    # Layer 1: contraction depth is only 3 -> do it on the VPU as broadcast
    # FMAs rather than a (mostly idle) MXU push.
    z = (w1[:, 0:1] * x[0:1, :]
         + w1[:, 1:2] * x[1:2, :]
         + w1[:, 2:3] * x[2:3, :]
         + b1_ref[...])                 # [50, TB]
    z = jnp.tanh(z)

    # Hidden layers 2-4: MXU matmuls (optionally bf16 inputs, f32 accumulate).
    for w_ref, b_ref in ((w2_ref, b2_ref), (w3_ref, b3_ref), (w4_ref, b4_ref)):
        z = jnp.tanh(
            jnp.dot(w_ref[...].astype(compute_dtype),
                    z.astype(compute_dtype),
                    preferred_element_type=jnp.float32)
            + b_ref[...])               # [50, TB]

    # Output layer (no activation).
    z = (jnp.dot(w5_ref[...].astype(compute_dtype),
                 z.astype(compute_dtype),
                 preferred_element_type=jnp.float32)
         + b5_ref[...])                 # [9, TB]

    o_ref[...] = z.astype(o_ref.dtype)


def net_forward(x, params, *, block_b=512, compute_dtype=jnp.float32):
    """Forward pass of Net.

    x:      [B, 3] float32
    params: list of 5 (W[out, in], b[out, 1]) pairs (PyTorch nn.Linear layout)
    Returns [B, 9] float32.
    """
    B = x.shape[0]
    n_blocks = pl.cdiv(B, block_b)
    B_pad = n_blocks * block_b

    # Batch on the lane (last) axis; pad to a whole number of lane-aligned blocks.
    x_t = x.T                                        # [3, B]
    if B_pad != B:
        x_t = jnp.pad(x_t, ((0, 0), (0, B_pad - B)))

    flat = []
    in_specs = [pl.BlockSpec((3, block_b), lambda i: (0, i))]
    for w, b in params:
        flat.extend([w, b])
        # Weights / biases: same block for every grid step -> VMEM-resident,
        # DMA'd only once.
        in_specs.append(pl.BlockSpec(w.shape, lambda i: (0, 0)))
        in_specs.append(pl.BlockSpec(b.shape, lambda i: (0, 0)))

    kernel = functools.partial(_net_kernel, compute_dtype=compute_dtype)

    out_t = pl.pallas_call(
        kernel,
        out_shape=jax.ShapeDtypeStruct((9, B_pad), jnp.float32),
        grid=(n_blocks,),
        in_specs=in_specs,
        out_specs=pl.BlockSpec((9, block_b), lambda i: (0, i)),
        compiler_params=pltpu.CompilerParams(
            dimension_semantics=("parallel",)),
    )(x_t, *flat)

    return out_t[:, :B].T                            # [B, 9]


def init_params(key):
    """Deterministic init matching Net.__init__ (PyTorch [out, in] layout)."""
    dims = [(3, 50), (50, 50), (50, 50), (50, 50), (50, 9)]
    params = []
    for fan_in, fan_out in dims:
        key, kw, kb = jax.random.split(key, 3)
        bound = fan_in ** -0.5                       # PyTorch default uniform bound
        w = jax.random.uniform(kw, (fan_out, fan_in), jnp.float32, -bound, bound)
        b = jax.random.uniform(kb, (fan_out, 1), jnp.float32, -bound, bound)
        params.append((w, b))
    return params


def net_reference(x, params):
    z = x
    for i, (w, b) in enumerate(params):
        z = jnp.dot(z, w.T, precision=jax.lax.Precision.HIGHEST) + b[:, 0]
        if i < len(params) - 1:
            z = jnp.tanh(z)
    return z


if __name__ == "__main__":
    key = jax.random.PRNGKey(0)
    k_x1, k_x2, k_p = jax.random.split(key, 3)

    params = init_params(k_p)

    # Small batch (typical call shape for this module); padded to one block.
    x_small = jax.random.normal(k_x1, (8, 3), dtype=jnp.float32)
    out_small = jax.block_until_ready(net_forward(x_small, params, block_b=128))
    ref_small = net_reference(x_small, params)
    assert out_small.shape == (8, 9), out_small.shape
    assert jnp.allclose(out_small, ref_small, atol=1e-4, rtol=1e-4), \
        "small-batch mismatch vs reference"

    # Larger batch: exercises the 4-step batch grid with VMEM-resident weights.
    x_big = jax.random.normal(k_x2, (1024, 3), dtype=jnp.float32)
    out_big = jax.block_until_ready(net_forward(x_big, params, block_b=256))
    ref_big = net_reference(x_big, params)
    assert out_big.shape == (1024, 9), out_big.shape
    assert jnp.allclose(out_big, ref_big, atol=1e-4, rtol=1e-4), \
        "large-batch mismatch vs reference"

    # bf16-input MXU path (f32 accumulation) -- looser tolerance.
    out_bf16 = jax.block_until_ready(
        net_forward(x_big, params, block_b=256, compute_dtype=jnp.bfloat16))
    assert jnp.allclose(out_bf16, ref_big, atol=1e-1, rtol=5e-2), \
        "bf16 path mismatch vs reference"

    print("KERNEL_OK")
</pallas_src>

<mosaic_0001>
module attributes {stable_mosaic.version = 11 : i64} {
  func.func @_net_kernel(%arg0: i32, %arg1: memref<3x128xf32, #tpu.memory_space<vmem>>, %arg2: memref<50x3xf32, #tpu.memory_space<vmem>>, %arg3: memref<50x1xf32, #tpu.memory_space<vmem>>, %arg4: memref<50x50xf32, #tpu.memory_space<vmem>>, %arg5: memref<50x1xf32, #tpu.memory_space<vmem>>, %arg6: memref<50x50xf32, #tpu.memory_space<vmem>>, %arg7: memref<50x1xf32, #tpu.memory_space<vmem>>, %arg8: memref<50x50xf32, #tpu.memory_space<vmem>>, %arg9: memref<50x1xf32, #tpu.memory_space<vmem>>, %arg10: memref<9x50xf32, #tpu.memory_space<vmem>>, %arg11: memref<9x1xf32, #tpu.memory_space<vmem>>, %arg12: memref<9x128xf32, #tpu.memory_space<vmem>>) attributes {dimension_semantics = [#tpu.dimension_semantics<parallel>], iteration_bounds = array<i64: 1>, scalar_prefetch = 0 : i64, scratch_operands = 0 : i64, tpu.core_type = #tpu.core_type<tc>, window_params = [{transform_indices = @transform_0, window_bounds = array<i64: 3, 128>}, {pipeline_mode = #tpu.pipeline_mode<synchronous>, transform_indices = @transform_1, window_bounds = array<i64: 50, 3>}, {pipeline_mode = #tpu.pipeline_mode<synchronous>, transform_indices = @transform_2, window_bounds = array<i64: 50, 1>}, {pipeline_mode = #tpu.pipeline_mode<synchronous>, transform_indices = @transform_3, window_bounds = array<i64: 50, 50>}, {pipeline_mode = #tpu.pipeline_mode<synchronous>, transform_indices = @transform_4, window_bounds = array<i64: 50, 1>}, {pipeline_mode = #tpu.pipeline_mode<synchronous>, transform_indices = @transform_5, window_bounds = array<i64: 50, 50>}, {pipeline_mode = #tpu.pipeline_mode<synchronous>, transform_indices = @transform_6, window_bounds = array<i64: 50, 1>}, {pipeline_mode = #tpu.pipeline_mode<synchronous>, transform_indices = @transform_7, window_bounds = array<i64: 50, 50>}, {pipeline_mode = #tpu.pipeline_mode<synchronous>, transform_indices = @transform_8, window_bounds = array<i64: 50, 1>}, {pipeline_mode = #tpu.pipeline_mode<synchronous>, transform_indices = @transform_9, window_bounds = array<i64: 9, 50>}, {pipeline_mode = #tpu.pipeline_mode<synchronous>, transform_indices = @transform_10, window_bounds = array<i64: 9, 1>}, {transform_indices = @transform_11, window_bounds = array<i64: 9, 128>}]} {
    %c0 = arith.constant 0 : index
    %c0_0 = arith.constant 0 : index
    %0 = vector.load %arg1[%c0, %c0_0] : memref<3x128xf32, #tpu.memory_space<vmem>>, vector<3x128xf32>
    %c0_1 = arith.constant 0 : index
    %c0_2 = arith.constant 0 : index
    %1 = vector.load %arg2[%c0_1, %c0_2] : memref<50x3xf32, #tpu.memory_space<vmem>>, vector<50x3xf32>
    %2 = vector.extract_strided_slice %1 {offsets = [0, 0], sizes = [50, 1], strides = [1, 1]} : vector<50x3xf32> to vector<50x1xf32>
    %3 = vector.extract_strided_slice %0 {offsets = [0, 0], sizes = [1, 128], strides = [1, 1]} : vector<3x128xf32> to vector<1x128xf32>
    %4 = vector.broadcast %2 : vector<50x1xf32> to vector<50x128xf32>
    %5 = vector.broadcast %3 : vector<1x128xf32> to vector<50x128xf32>
    %6 = arith.mulf %4, %5 : vector<50x128xf32>
    %7 = vector.extract_strided_slice %1 {offsets = [0, 1], sizes = [50, 1], strides = [1, 1]} : vector<50x3xf32> to vector<50x1xf32>
    %8 = vector.extract_strided_slice %0 {offsets = [1, 0], sizes = [1, 128], strides = [1, 1]} : vector<3x128xf32> to vector<1x128xf32>
    %9 = vector.broadcast %7 : vector<50x1xf32> to vector<50x128xf32>
    %10 = vector.broadcast %8 : vector<1x128xf32> to vector<50x128xf32>
    %11 = arith.mulf %9, %10 : vector<50x128xf32>
    %12 = arith.addf %6, %11 : vector<50x128xf32>
    %13 = vector.extract_strided_slice %1 {offsets = [0, 2], sizes = [50, 1], strides = [1, 1]} : vector<50x3xf32> to vector<50x1xf32>
    %14 = vector.extract_strided_slice %0 {offsets = [2, 0], sizes = [1, 128], strides = [1, 1]} : vector<3x128xf32> to vector<1x128xf32>
    %15 = vector.broadcast %13 : vector<50x1xf32> to vector<50x128xf32>
    %16 = vector.broadcast %14 : vector<1x128xf32> to vector<50x128xf32>
    %17 = arith.mulf %15, %16 : vector<50x128xf32>
    %18 = arith.addf %12, %17 : vector<50x128xf32>
    %c0_3 = arith.constant 0 : index
    %c0_4 = arith.constant 0 : index
    %19 = vector.load %arg3[%c0_3, %c0_4] : memref<50x1xf32, #tpu.memory_space<vmem>>, vector<50x1xf32>
    %20 = vector.broadcast %19 : vector<50x1xf32> to vector<50x128xf32>
    %21 = arith.addf %18, %20 : vector<50x128xf32>
    %22 = math.tanh %21 : vector<50x128xf32>
    %c0_5 = arith.constant 0 : index
    %c0_6 = arith.constant 0 : index
    %23 = vector.load %arg4[%c0_5, %c0_6] : memref<50x50xf32, #tpu.memory_space<vmem>>, vector<50x50xf32>
    %cst = arith.constant dense<0.000000e+00> : vector<50x128xf32>
    %24 = tpu.matmul %23, %22, %cst {dimension_numbers = #tpu.dot_dimension_numbers<[1], [0], [0], [1], [0, 0, 1, 1], [], []>} : vector<50x50xf32>, vector<50x128xf32>, vector<50x128xf32> -> vector<50x128xf32>
    %c0_7 = arith.constant 0 : index
    %c0_8 = arith.constant 0 : index
    %25 = vector.load %arg5[%c0_7, %c0_8] : memref<50x1xf32, #tpu.memory_space<vmem>>, vector<50x1xf32>
    %26 = vector.broadcast %25 : vector<50x1xf32> to vector<50x128xf32>
    %27 = arith.addf %24, %26 : vector<50x128xf32>
    %28 = math.tanh %27 : vector<50x128xf32>
    %c0_9 = arith.constant 0 : index
    %c0_10 = arith.constant 0 : index
    %29 = vector.load %arg6[%c0_9, %c0_10] : memref<50x50xf32, #tpu.memory_space<vmem>>, vector<50x50xf32>
    %cst_11 = arith.constant dense<0.000000e+00> : vector<50x128xf32>
    %30 = tpu.matmul %29, %28, %cst_11 {dimension_numbers = #tpu.dot_dimension_numbers<[1], [0], [0], [1], [0, 0, 1, 1], [], []>} : vector<50x50xf32>, vector<50x128xf32>, vector<50x128xf32> -> vector<50x128xf32>
    %c0_12 = arith.constant 0 : index
    %c0_13 = arith.constant 0 : index
    %31 = vector.load %arg7[%c0_12, %c0_13] : memref<50x1xf32, #tpu.memory_space<vmem>>, vector<50x1xf32>
    %32 = vector.broadcast %31 : vector<50x1xf32> to vector<50x128xf32>
    %33 = arith.addf %30, %32 : vector<50x128xf32>
    %34 = math.tanh %33 : vector<50x128xf32>
    %c0_14 = arith.constant 0 : index
    %c0_15 = arith.constant 0 : index
    %35 = vector.load %arg8[%c0_14, %c0_15] : memref<50x50xf32, #tpu.memory_space<vmem>>, vector<50x50xf32>
    %cst_16 = arith.constant dense<0.000000e+00> : vector<50x128xf32>
    %36 = tpu.matmul %35, %34, %cst_16 {dimension_numbers = #tpu.dot_dimension_numbers<[1], [0], [0], [1], [0, 0, 1, 1], [], []>} : vector<50x50xf32>, vector<50x128xf32>, vector<50x128xf32> -> vector<50x128xf32>
    %c0_17 = arith.constant 0 : index
    %c0_18 = arith.constant 0 : index
    %37 = vector.load %arg9[%c0_17, %c0_18] : memref<50x1xf32, #tpu.memory_space<vmem>>, vector<50x1xf32>
    %38 = vector.broadcast %37 : vector<50x1xf32> to vector<50x128xf32>
    %39 = arith.addf %36, %38 : vector<50x128xf32>
    %40 = math.tanh %39 : vector<50x128xf32>
    %c0_19 = arith.constant 0 : index
    %c0_20 = arith.constant 0 : index
    %41 = vector.load %arg10[%c0_19, %c0_20] : memref<9x50xf32, #tpu.memory_space<vmem>>, vector<9x50xf32>
    %cst_21 = arith.constant dense<0.000000e+00> : vector<9x128xf32>
    %42 = tpu.matmul %41, %40, %cst_21 {dimension_numbers = #tpu.dot_dimension_numbers<[1], [0], [0], [1], [0, 0, 1, 1], [], []>} : vector<9x50xf32>, vector<50x128xf32>, vector<9x128xf32> -> vector<9x128xf32>
    %c0_22 = arith.constant 0 : index
    %c0_23 = arith.constant 0 : index
    %43 = vector.load %arg11[%c0_22, %c0_23] : memref<9x1xf32, #tpu.memory_space<vmem>>, vector<9x1xf32>
    %44 = vector.broadcast %43 : vector<9x1xf32> to vector<9x128xf32>
    %45 = arith.addf %42, %44 : vector<9x128xf32>
    %c0_24 = arith.constant 0 : index
    %c0_25 = arith.constant 0 : index
    %46 = vector.load %arg12[%c0_24, %c0_25] : memref<9x128xf32, #tpu.memory_space<vmem>>, vector<9x128xf32>
    tpu.vector_store %arg12[%c0_24, %c0_25], %45 {strides = array<i32>} : memref<9x128xf32, #tpu.memory_space<vmem>>, vector<9x128xf32>,
    return
  }
  func.func @transform_0(%arg0: i32) -> (i32, i32) {
    %c0_i32 = arith.constant 0 : i32
    %c0_i32_0 = arith.constant 0 : i32
    return %c0_i32, %arg0 : i32, i32
  }
  func.func @transform_1(%arg0: i32) -> (i32, i32) {
    %c0_i32 = arith.constant 0 : i32
    %c0_i32_0 = arith.constant 0 : i32
    %c0_i32_1 = arith.constant 0 : i32
    return %c0_i32, %c0_i32_0 : i32, i32
  }
  func.func @transform_2(%arg0: i32) -> (i32, i32) {
    %c0_i32 = arith.constant 0 : i32
    %c0_i32_0 = arith.constant 0 : i32
    %c0_i32_1 = arith.constant 0 : i32
    return %c0_i32, %c0_i32_0 : i32, i32
  }
  func.func @transform_3(%arg0: i32) -> (i32, i32) {
    %c0_i32 = arith.constant 0 : i32
    %c0_i32_0 = arith.constant 0 : i32
    %c0_i32_1 = arith.constant 0 : i32
    return %c0_i32, %c0_i32_0 : i32, i32
  }
  func.func @transform_4(%arg0: i32) -> (i32, i32) {
    %c0_i32 = arith.constant 0 : i32
    %c0_i32_0 = arith.constant 0 : i32
    %c0_i32_1 = arith.constant 0 : i32
    return %c0_i32, %c0_i32_0 : i32, i32
  }
  func.func @transform_5(%arg0: i32) -> (i32, i32) {
    %c0_i32 = arith.constant 0 : i32
    %c0_i32_0 = arith.constant 0 : i32
    %c0_i32_1 = arith.constant 0 : i32
    return %c0_i32, %c0_i32_0 : i32, i32
  }
  func.func @transform_6(%arg0: i32) -> (i32, i32) {
    %c0_i32 = arith.constant 0 : i32
    %c0_i32_0 = arith.constant 0 : i32
    %c0_i32_1 = arith.constant 0 : i32
    return %c0_i32, %c0_i32_0 : i32, i32
  }
  func.func @transform_7(%arg0: i32) -> (i32, i32) {
    %c0_i32 = arith.constant 0 : i32
    %c0_i32_0 = arith.constant 0 : i32
    %c0_i32_1 = arith.constant 0 : i32
    return %c0_i32, %c0_i32_0 : i32, i32
  }
  func.func @transform_8(%arg0: i32) -> (i32, i32) {
    %c0_i32 = arith.constant 0 : i32
    %c0_i32_0 = arith.constant 0 : i32
    %c0_i32_1 = arith.constant 0 : i32
    return %c0_i32, %c0_i32_0 : i32, i32
  }
  func.func @transform_9(%arg0: i32) -> (i32, i32) {
    %c0_i32 = arith.constant 0 : i32
    %c0_i32_0 = arith.constant 0 : i32
    %c0_i32_1 = arith.constant 0 : i32
    return %c0_i32, %c0_i32_0 : i32, i32
  }
  func.func @transform_10(%arg0: i32) -> (i32, i32) {
    %c0_i32 = arith.constant 0 : i32
    %c0_i32_0 = arith.constant 0 : i32
    %c0_i32_1 = arith.constant 0 : i32
    return %c0_i32, %c0_i32_0 : i32, i32
  }
  func.func @transform_11(%arg0: i32) -> (i32, i32) {
    %c0_i32 = arith.constant 0 : i32
    %c0_i32_0 = arith.constant 0 : i32
    return %c0_i32, %arg0 : i32, i32
  }
}

</mosaic_0001>

<bundles_post_ra>
// kernel: tpu_custom_call.1
= control target key start
LH: loop header
LB: loop body
LE: loop exit
PB: predicated region body
PF: predicated region fallthrough
CT: control target
= control target key end

     0   :  { %v1217_v2 = vmov 0   ;;  %v1218_v4 = vmov 1   ;;  %v1219_v6 = vmov 2   ;;  %s1607_s0 = inlined_call_operand.vmem [shape: f32[3,128], index: 0, kind: input, shape index: {}]   ;;  %s1608_s1 = inlined_call_operand.vmem [shape: f32[50,3], index: 1, kind: input, shape index: {}]   ;;  %s1609_s2 = inlined_call_operand.vmem [shape: f32[50,1], index: 2, kind: input, shape index: {}]   ;;  %s1610_s3 = inlined_call_operand.vmem [shape: f32[50,50], index: 3, kind: input, shape index: {}]   ;;  %s1611_s4 = inlined_call_operand.vmem [shape: f32[50,1], index: 4, kind: input, shape index: {}]   ;;  %s1612_s5 = inlined_call_operand.vmem [shape: f32[50,50], index: 5, kind: input, shape index: {}]   ;;  %s1613_s6 = inlined_call_operand.vmem [shape: f32[50,1], index: 6, kind: input, shape index: {}]   ;;  %s1614_s7 = inlined_call_operand.vmem [shape: f32[50,50], index: 7, kind: input, shape index: {}]   ;;  %s1615_s8 = inlined_call_operand.vmem [shape: f32[50,1], index: 8, kind: input, shape index: {}]   ;;  %s1616_s9 = inlined_call_operand.vmem [shape: f32[9,50], index: 9, kind: input, shape index: {}]   ;;  %s1617_s10 = inlined_call_operand.vmem [shape: f32[9,1], index: 10, kind: input, shape index: {}]   ;;  %s1618_s11 = inlined_call_operand.hbm [shape: f32[9,128], index: 11, kind: output, shape index: {}]  }
   0x1   :  { %v46_v0 = vld [vmem:[%s1608_s1 + $0x30] sm:$0x3]  ;;  %v45_v1 = vld [vmem:[%s1608_s1 + $0x28] sm:$0xff]  ;;  %1122 = vset.pattern.permute.xlu1 %v1217_v2  ;;  %1121 = vset.pattern.permute.xlu0 %v1217_v2  ;;  %v44_v3 = vld [vmem:[%s1608_s1 + $0x20] sm:$0xff] }
   0x2   :  { %79 = vperm.xlu0 %1121, %v46_v0   ;;  %74 = vperm.xlu1 %1122, %v45_v1   ;;  %v43_v5 = vld [vmem:[%s1608_s1 + $0x18] sm:$0xff]  ;;  %v41_v7 = vld [vmem:[%s1608_s1 + $0x8] sm:$0xff] }
   0x6   :  { %1123 = vset.pattern.permute.xlu1 %v1218_v4  ;;  %69 = vperm.xlu0 %1121, %v44_v3  }
   0x7   :  { %114 = vperm.xlu1 %1123, %v45_v1  }
   0xa   :  { %64 = vperm.xlu0 %1121, %v43_v5  }
   0xb   :  { %1124 = vset.pattern.permute.xlu1 %v1219_v6 }
   0xc   :  { %164 = vperm.xlu1 %1124, %v46_v0  }
   0xd   :  { %16 = vsyncpa [#allocation3], 0  ;;  %v189_v8 = vld [vmem:[%s1609_s2 + $0x20] sm:$0xff]  ;;  %v42_v9 = vld [vmem:[%s1608_s1 + $0x10] sm:$0xff]  ;;  %v1220_v14 = vmov 0.0   ;;  %vm1221_vm0 = vmmov 0   ;;  %v82_v45 = vlaneseq }
   0xe   :  { %54 = vperm.xlu0 %1121, %v41_v7   ;;  %v40_v10 = vld [vmem:[%s1608_s1] sm:$0xff]  ;;  %v191_v11 = vld [vmem:[%s1609_s2 + $0x30] sm:$0x3]  ;;  %v190_v13 = vld [vmem:[%s1609_s2 + $0x28] sm:$0xff]  ;;  %977 = vmatprep.subr.mxu0 %v1220_v14  ;;  %vm312_vm1 = vcmask 1041408   ;;  %vm290_vm2 = vcmask 408576  }
   0xf   :  { %v185_v12 = vld [vmem:[%s1609_s2] sm:$0xff]  ;;  %1099 = vmatprep.subr.mxu1 %v1220_v14  ;;  %v250_v16 = vld [vmem:[%s1611_s4 + $0x10] sm:$0xff]  ;;  %v435_v18 = vld [vmem:[%s1613_s6 + $0x28] sm:$0xff]  ;;  %991 = vmatprep.mubr.msk.f32.mxu0 %vm1221_vm0, %v1220_v14  ;;  %v83_v48 = vshrl.u32 %v82_v45, 7  ;;  %s1222_s21 = smov [#allocation2]  }
  0x10   :  { %1125 = vset.pattern.permute.xlu1 %v1218_v4  ;;  %v252_v15 = vld [vmem:[%s1611_s4 + $0x20] sm:$0xff]  ;;  %v433_v19 = vld [vmem:[%s1613_s6 + $0x18] sm:$0xff]  ;;  %v431_v20 = vld [vmem:[%s1613_s6 + $0x8] sm:$0xff]  ;;  %1003 = vmatprep.mubr.msk.f32.mxu1 %vm1221_vm0, %v1220_v14  ;;  %s888_s22 = sshll.u32 %s1222_s21, 4  ;;  %s889_s22 = int_to_ptr.vmem [resolvable:$true] %s888_s22 }
  0x11   :  { %110 = vperm.xlu1 %1125, %v44_v3   ;;  %v248_v17 = vld [vmem:[%s1611_s4] sm:$0xff]  ;;  %v188_v21 = vld [vmem:[%s1609_s2 + $0x18] sm:$0xff]  ;;  %v616_v22 = vld [vmem:[%s1615_s8 + $0x30] sm:$0x3]  ;;  %v84_v50 = vsub.s32 0, %v83_v48  ;;  %v123_v53 = vsub.s32 1, %v83_v48  ;;  %p1200_p1 = scmp.lt.s32.totalorder %s889_s22, %s889_s22 }
  0x12   :  { %214 = vperm.xlu0 %1121, %v189_v8   ;;  %v187_v23 = vld [vmem:[%s1609_s2 + $0x10] sm:$0xff]  ;;  %v614_v24 = vld [vmem:[%s1615_s8 + $0x20] sm:$0xff]  ;;  %v186_v25 = vld [vmem:[%s1609_s2 + $0x8] sm:$0xff]  ;;  %v169_v56 = vsub.s32 2, %v83_v48  ;;  %s1195_s23 = scalar_lea.vmem %s889_s22, 256 }
  0x13   :  { %v612_v26 = vld [vmem:[%s1615_s8 + $0x10] sm:$0xff]  ;;  %v610_v28 = vld [vmem:[%s1615_s8] sm:$0xff]  ;;  %v253_v29 = vld [vmem:[%s1611_s4 + $0x28] sm:$0xff]  ;;  %p1196_p0 = scmp.ne.s32.totalorder %s889_s22, %s1195_s23  ;;  %p1201_p2 = scmp.lt.s32.totalorder %s1195_s23, %s1195_s23 }
  0x14   :  { %v254_v27 = vld [vmem:[%s1611_s4 + $0x30] sm:$0x3]  ;;  %v786_v30 = vld [vmem:[%s1617_s10 + $0x8] sm:$0x1]  ;;  %v251_v31 = vld [vmem:[%s1611_s4 + $0x18] sm:$0xff] }
  0x15   :  { %1126 = vset.pattern.permute.xlu1 %v1219_v6  ;;  %v249_v32 = vld [vmem:[%s1611_s4 + $0x8] sm:$0xff]  ;;  %v436_v33 = vld [vmem:[%s1613_s6 + $0x30] sm:$0x3]  ;;  %v434_v34 = vld [vmem:[%s1613_s6 + $0x20] sm:$0xff]  ;;  %p1202_p3 = por %p1201_p2, %p1200_p1 }
  0x16   :  { %160 = vperm.xlu1 %1126, %v45_v1   ;;  %1133 = vset.pattern.permute.xlu0 %v1218_v4  ;;  %v432_v35 = vld [vmem:[%s1613_s6 + $0x10] sm:$0xff]  ;;  %v430_v36 = vld [vmem:[%s1613_s6] sm:$0xff]  ;;  %v615_v37 = vld [vmem:[%s1615_s8 + $0x28] sm:$0xff] }
  0x17   :  { %118 = vperm.xlu0 %1133, %v46_v0   ;;  %v613_v38 = vld [vmem:[%s1615_s8 + $0x18] sm:$0xff]  ;;  %v611_v39 = vld [vmem:[%s1615_s8 + $0x8] sm:$0xff]  ;;  %v785_v40 = vld [vmem:[%s1617_s10] sm:$0xff]  ;;  %p1203_p4 = pnand %p1202_p3, %p1196_p0 }
  0x18   :  { %v39_v52 = vld [vmem:[%s1607_s0] sm:$0x7] }
  0x19   :  { %v1414_v55 = vrot.slane %v39_v52, %v84_v50  ;;  %v1416_v57 = vrot.slane %v39_v52, %v123_v53  ;;  %v1420_v62 = vrot.slane %v39_v52, %v169_v56 }
  0x1a   :  { %1127 = vset.pattern.permute.xlu1 %v1218_v4 }
  0x1b   :  { %106 = vperm.xlu1 %1127, %v43_v5   ;;  %102 = vperm.xlu0 %1133, %v42_v9  }
  0x1f   :  { %1128 = vset.pattern.permute.xlu1 %v1217_v2  ;;  %94 = vperm.xlu0 %1133, %v40_v10  }
  0x20   :  { %224 = vperm.xlu1 %1128, %v191_v11  }
  0x23   :  { %1135 = vset.pattern.permute.xlu0 %v1219_v6 }
  0x24   :  { %59 = vperm.xlu1 %1128, %v42_v9   ;;  %156 = vperm.xlu0 %1135, %v44_v3  }
  0x28   :  { %1129 = vset.pattern.permute.xlu1 %v1219_v6  ;;  %140 = vperm.xlu0 %1135, %v40_v10  }
  0x29   :  { %152 = vperm.xlu1 %1129, %v43_v5  }
  0x2c   :  { %1138 = vset.pattern.permute.xlu0 %v1217_v2 }
  0x2d   :  { %1130 = vset.pattern.permute.xlu1 %v1217_v2  ;;  %194 = vperm.xlu0 %1138, %v185_v12  }
  0x2e   :  { %219 = vperm.xlu1 %1130, %v190_v13  }
  0x31   :  { %277 = vperm.xlu0 %1138, %v252_v15  }
  0x32   :  { %1131 = vset.pattern.permute.xlu1 %v1218_v4 }
  0x33   :  { %98 = vperm.xlu1 %1131, %v41_v7  }
  0x35   :  { %267 = vperm.xlu0 %1138, %v250_v16  }
  0x37   :  { %1132 = vset.pattern.permute.xlu1 %v1219_v6 }
  0x38   :  { %148 = vperm.xlu1 %1132, %v42_v9  }
  0x39   :  { %257 = vperm.xlu0 %1138, %v248_v17  }
  0x3c   :  { %1134 = vset.pattern.permute.xlu1 %v1217_v2 }
  0x3d   :  { %464 = vperm.xlu0 %1138, %v435_v18   ;;  %49 = vperm.xlu1 %1134, %v40_v10  }
  0x41   :  { %454 = vperm.xlu0 %1138, %v433_v19   ;;  %1136 = vset.pattern.permute.xlu1 %v1219_v6 }
  0x42   :  { %144 = vperm.xlu1 %1136, %v41_v7  }
  0x45   :  { %444 = vperm.xlu0 %1138, %v431_v20  }
  0x46   :  { %1137 = vset.pattern.permute.xlu1 %v1217_v2 }
  0x47   :  { %209 = vperm.xlu1 %1137, %v188_v21  }
  0x49   :  { %649 = vperm.xlu0 %1138, %v616_v22  }
  0x4b   :  { %204 = vperm.xlu1 %1137, %v187_v23  }
  0x4d   :  { %639 = vperm.xlu0 %1138, %v614_v24  }
  0x4f   :  { %199 = vperm.xlu1 %1137, %v186_v25  }
  0x51   :  { %629 = vperm.xlu0 %1138, %v612_v26  }
  0x53   :  { %287 = vperm.xlu1 %1137, %v254_v27  }
  0x55   :  { %619 = vperm.xlu0 %1138, %v610_v28  }
  0x57   :  { %282 = vperm.xlu1 %1137, %v253_v29  }
  0x59   :  { %794 = vperm.xlu0 %1138, %v786_v30  }
  0x5b   :  { %272 = vperm.xlu1 %1137, %v251_v31  }
  0x5f   :  { %262 = vperm.xlu1 %1137, %v249_v32  }
  0x63   :  { %469 = vperm.xlu1 %1137, %v436_v33  }
  0x67   :  { %459 = vperm.xlu1 %1137, %v434_v34  }
  0x6b   :  { %449 = vperm.xlu1 %1137, %v432_v35  }
  0x6f   :  { %439 = vperm.xlu1 %1137, %v430_v36  }
  0x73   :  { %644 = vperm.xlu1 %1137, %v615_v37  }
  0x77   :  { %634 = vperm.xlu1 %1137, %v613_v38  }
  0x7b   :  { %624 = vperm.xlu1 %1137, %v611_v39  }
  0x7d   :  { %v75_v41 = vpop.permute.xlu1 %74  ;;  %v80_v42 = vpop.permute.xlu0 %79 }
  0x7e   :  { %v92_v59 = vmul.f32 %v1414_v55, %v80_v42  ;;  %v91_v13 = vmul.f32 %v1414_v55, %v75_v41 }
  0x7f   :  { %789 = vperm.xlu1 %1137, %v785_v40  }
  0x81   :  { %v70_v43 = vpop.permute.xlu0 %69 }
  0x82   :  { %v115_v44 = vpop.permute.xlu1 %114  ;;  %v90_v9 = vmul.f32 %v1414_v55, %v70_v43 }
  0x83   :  { %v130_v11 = vmul.f32 %v1416_v57, %v115_v44 }
  0x85   :  { %v65_v46 = vpop.permute.xlu0 %64  ;;  %v137_v18 = vadd.f32 %v130_v11, %v91_v13 }
  0x86   :  { %v89_v30 = vmul.f32 %v1414_v55, %v65_v46 }
  0x87   :  { %v165_v47 = vpop.permute.xlu1 %164 }
  0x88   :  { %v177_v2 = vmul.f32 %v1420_v62, %v165_v47 }
  0x89   :  { %v1409_v49 = vpop.permute.xlu0 %54 }
  0x8a   :  { %v87_v48 = vmul.f32 %v1414_v55, %v1409_v49 }
  0x8c   :  { %v111_v51 = vpop.permute.xlu1 %110 }
  0x8d   :  { %v215_v54 = vpop.permute.xlu0 %214  ;;  %v129_v10 = vmul.f32 %v1416_v57, %v111_v51 }
  0x8f   :  { %v136_v15 = vadd.f32 %v129_v10, %v90_v9 }
  0x91   :  { %v161_v58 = vpop.permute.xlu1 %160 }
  0x92   :  { %v119_v60 = vpop.permute.xlu0 %118  ;;  %v176_v16 = vmul.f32 %v1420_v62, %v161_v58 }
  0x93   :  { %v131_v61 = vmul.f32 %v1416_v57, %v119_v60 }
  0x94   :  { %v183_v20 = vadd.f32 %v176_v16, %v137_v18 }
  0x95   :  { %v138_v63 = vadd.f32 %v131_v61, %v92_v59 }
  0x96   :  { %v107_v0 = vpop.permute.xlu1 %106  ;;  %v103_v1 = vpop.permute.xlu0 %102 }
  0x97   :  { %v184_v3 = vadd.f32 %v177_v2, %v138_v63  ;;  %v128_v31 = vmul.f32 %v1416_v57, %v107_v0  ;;  %v127_v34 = vmul.f32 %v1416_v57, %v103_v1  ;;  %v245_v0 = vld [vmem:[%s1610_s3 + $0x20] sm:$0xff]  ;;  %v242_v2 = vld [vmem:[%s1610_s3 + $0x8] sm:$0xff] }
  0x99   :  { %v135_v36 = vadd.f32 %v128_v31, %v89_v30 }
  0x9a   :  { %v95_v4 = vpop.permute.xlu0 %94 }
  0x9b   :  { %v225_v5 = vpop.permute.xlu1 %224  ;;  %v125_v38 = vmul.f32 %v1416_v57, %v95_v4  ;;  %v243_v4 = vld [vmem:[%s1610_s3 + $0x10] sm:$0xff] }
  0x9c   :  { %v233_v6 = vadd.f32 %v225_v5, %v184_v3  ;;  %v246_v3 = vld [vmem:[%s1610_s3 + $0x28] sm:$0xff]  ;;  %v247_v5 = vld [vmem:[%s1610_s3 + $0x30] sm:$0x3] }
  0x9e   :  { %1139 = vtanh.f32 %v233_v6  ;;  %v244_v6 = vld [vmem:[%s1610_s3 + $0x18] sm:$0xff] }
  0x9f   :  { %v60_v7 = vpop.permute.xlu1 %59  ;;  %v157_v8 = vpop.permute.xlu0 %156 }
  0xa0   :  { %v175_v12 = vmul.f32 %v1420_v62, %v157_v8  ;;  %v88_v35 = vmul.f32 %v1414_v55, %v60_v7 }
  0xa2   :  { %v182_v19 = vadd.f32 %v175_v12, %v136_v15  ;;  %v134_v41 = vadd.f32 %v127_v34, %v88_v35 }
  0xa3   :  { %v141_v42 = vpop.permute.xlu0 %140 }
  0xa4   :  { %v153_v17 = vpop.permute.xlu1 %152  ;;  %v231_v22 = vadd.f32 %v215_v54, %v182_v19  ;;  %v171_v44 = vmul.f32 %v1420_v62, %v141_v42  ;;  %v423_v42 = vld [vmem:[%s1612_s5] sm:$0xff] }
  0xa5   :  { %v174_v32 = vmul.f32 %v1420_v62, %v153_v17 }
  0xa7   :  { %v181_v40 = vadd.f32 %v174_v32, %v135_v36 }
  0xa8   :  { %v195_v59 = vpop.permute.xlu0 %194 }
  0xa9   :  { %v220_v21 = vpop.permute.xlu1 %219 }
  0xaa   :  { %v232_v23 = vadd.f32 %v220_v21, %v183_v20 }
  0xab   :  { %v1140_v24 = vpop.eup %1139 }
  0xac   :  { %1141 = vtanh.f32 %v232_v23  ;;  %978 = vmatpush3.msk.msra.mxu0 %vm312_vm1, %v1140_v24  ;;  %1106 = vmatpush3.msk.msra.mxu1 %vm312_vm1, %v1140_v24  ;;  %v278_v18 = vpop.permute.xlu0 %277 }
  0xad   :  { %979 = vmatprep.subr.mxu0 %v1220_v14  ;;  %1100 = vmatprep.subr.mxu1 %v1220_v14  ;;  %1143 = vtanh.f32 %v231_v22 }
  0xae   :  { %v99_v25 = vpop.permute.xlu1 %98 }
  0xaf   :  { %v126_v45 = vmul.f32 %v1416_v57, %v99_v25 }
  0xb1   :  { %v133_v53 = vadd.f32 %v126_v45, %v87_v48  ;;  %v425_v45 = vld [vmem:[%s1612_s5 + $0x10] sm:$0xff]  ;;  %v428_v48 = vld [vmem:[%s1612_s5 + $0x28] sm:$0xff] }
  0xb3   :  { %v149_v26 = vpop.permute.xlu1 %148 }
  0xb4   :  { %v173_v39 = vmul.f32 %v1420_v62, %v149_v26 }
  0xb6   :  { %v180_v51 = vadd.f32 %v173_v39, %v134_v41 }
  0xb8   :  { %v50_v27 = vpop.permute.xlu1 %49 }
  0xb9   :  { %v1142_v28 = vpop.eup %1141  ;;  %v86_v37 = vmul.f32 %v1414_v55, %v50_v27 }
  0xba   :  { %980 = vmatpush3.msra.mxu0 %v1142_v28  ;;  %1107 = vmatpush3.msra.mxu1 %v1142_v28  ;;  %v1144_v29 = vpop.eup %1143  ;;  %v268_v28 = vpop.permute.xlu0 %267 }
  0xbb   :  { %981 = vmatprep.subr.mxu0 %v1220_v14  ;;  %1101 = vmatprep.subr.mxu1 %v1220_v14  ;;  %v132_v46 = vadd.f32 %v125_v38, %v86_v37 }
  0xbc   :  { %982 = vmatpush3.msra.mxu0 %v1144_v29  ;;  %1108 = vmatpush3.msra.mxu1 %v1144_v29 }
  0xbd   :  { %v145_v33 = vpop.permute.xlu1 %144  ;;  %983 = vmatprep.subr.mxu0 %v1220_v14  ;;  %1102 = vmatprep.subr.mxu1 %v1220_v14  ;;  %v178_v54 = vadd.f32 %v171_v44, %v132_v46  ;;  %v424_v44 = vld [vmem:[%s1612_s5 + $0x8] sm:$0xff]  ;;  %v426_v46 = vld [vmem:[%s1612_s5 + $0x18] sm:$0xff] }
  0xbe   :  { %v172_v50 = vmul.f32 %v1420_v62, %v145_v33  ;;  %v241_v62 = vld [vmem:[%s1610_s3] sm:$0xff]  ;;  %v258_v34 = vpop.permute.xlu0 %257 }
  0xbf   :  { %v227_v61 = vadd.f32 %v195_v59, %v178_v54 }
  0xc0   :  { %v179_v58 = vadd.f32 %v172_v50, %v133_v53  ;;  %v429_v50 = vld [vmem:[%s1612_s5 + $0x30] sm:$0x3] }
  0xc2   :  { %v210_v43 = vpop.permute.xlu1 %209 }
  0xc3   :  { %v230_v47 = vadd.f32 %v210_v43, %v181_v40 }
  0xc5   :  { %1145 = vtanh.f32 %v230_v47  ;;  %v427_v47 = vld [vmem:[%s1612_s5 + $0x20] sm:$0xff] }
  0xc6   :  { %v205_v52 = vpop.permute.xlu1 %204 }
  0xc7   :  { %v229_v56 = vadd.f32 %v205_v52, %v180_v51 }
  0xc9   :  { %1147 = vtanh.f32 %v229_v56 }
  0xca   :  { %v200_v60 = vpop.permute.xlu1 %199 }
  0xcb   :  { %v228_v63 = vadd.f32 %v200_v60, %v179_v58 }
  0xcd   :  { %1149 = vtanh.f32 %v228_v63 }
  0xce   :  { %1151 = vtanh.f32 %v227_v61  ;;  %v288_v7 = vpop.permute.xlu1 %287 }
  0xd2   :  { %v1146_v57 = vpop.eup %1145  ;;  %v283_v15 = vpop.permute.xlu1 %282 }
  0xd3   :  { %984 = vmatpush3.msra.mxu0 %v1146_v57  ;;  %1109 = vmatpush3.msra.mxu1 %v1146_v57 }
  0xd4   :  { %985 = vmatprep.subr.mxu0 %v1220_v14  ;;  %1103 = vmatprep.subr.mxu1 %v1220_v14 }
  0xd6   :  { %v1148_v49 = vpop.eup %1147  ;;  %v273_v25 = vpop.permute.xlu1 %272 }
  0xd7   :  { %986 = vmatpush3.msra.mxu0 %v1148_v49  ;;  %1110 = vmatpush3.msra.mxu1 %v1148_v49  ;;  %v465_v49 = vpop.permute.xlu0 %464 }
  0xd8   :  { %987 = vmatprep.subr.mxu0 %v1220_v14  ;;  %1104 = vmatprep.subr.mxu1 %v1220_v14 }
  0xda   :  { %v1150_v55 = vpop.eup %1149  ;;  %v263_v32 = vpop.permute.xlu1 %262 }
  0xdb   :  { %988 = vmatpush3.msra.mxu0 %v1150_v55  ;;  %1111 = vmatpush3.msra.mxu1 %v1150_v55  ;;  %v1152_v1 = vpop.eup %1151 }
  0xdc   :  { %989 = vmatprep.subr.mxu0 %v1220_v14  ;;  %1105 = vmatprep.subr.mxu1 %v1220_v14 }
  0xdd   :  { %990 = vmatpush3.msra.mxu0 %v1152_v1  ;;  %1112 = vmatpush3.msra.mxu1 %v1152_v1 }
  0xde   :  { %992 = vmatmul.mubr.msk.f32.vlgmr.msra.gmra.mxu0 %vm290_vm2, %v241_v62  ;;  %1004 = vmatmul.mubr.msk.f32.vlgmr.msra.gmra.mxu1 %vm290_vm2, %v245_v0  ;;  %v470_v61 = vpop.permute.xlu1 %469 }
  0xdf   :  { %994 = vmatprep.mubr.msk.f32.mxu0 %vm1221_vm0, %v1220_v14  ;;  %1006 = vmatprep.mubr.msk.f32.mxu1 %vm1221_vm0, %v1220_v14 }
  0xe0   :  { %1012 = vmatprep.subr.mxu1 %v1220_v14  ;;  %1047 = vmatprep.subr.mxu0 %v1220_v14 }
  0xe2   :  { %995 = vmatmul.mubr.msk.f32.gmra.mxu0 %vm290_vm2, %v242_v2  ;;  %1007 = vmatmul.mubr.msk.f32.gmra.mxu1 %vm290_vm2, %v246_v3  ;;  %v460_v62 = vpop.permute.xlu1 %459 }
  0xe3   :  { %997 = vmatprep.mubr.msk.f32.mxu0 %vm1221_vm0, %v1220_v14  ;;  %1009 = vmatprep.mubr.msk.f32.mxu1 %vm1221_vm0, %v1220_v14 }
  0xe6   :  { %998 = vmatmul.mubr.msk.f32.gmra.mxu0 %vm290_vm2, %v243_v4  ;;  %1010 = vmatmul.mubr.msk.f32.gmra.mxu1 %vm290_vm2, %v247_v5  ;;  %v455_v4 = vpop.permute.xlu0 %454 }
  0xe7   :  { %1000 = vmatprep.mubr.msk.f32.mxu0 %vm1221_vm0, %v1220_v14  ;;  %1026 = vmatprep.mubr.msk.f32.mxu1 %vm1221_vm0, %v1220_v14 }
  0xea   :  { %1001 = vmatmul.mubr.msk.f32.gmra.mxu0 %vm290_vm2, %v244_v6 }
  0xeb   :  { %1061 = vmatprep.mubr.msk.f32.mxu0 %vm1221_vm0, %v1220_v14 }
 0x19e   :  { %v382_v8 = vpop.f32.mrf.mxu0  ;;  %v402_v9 = vpop.f32.mrf.mxu1 }
 0x19f   :  { %v403_v26 = vadd.f32 %v402_v9, %v278_v18  ;;  %v383_v35 = vadd.f32 %v382_v8, %v258_v34 }
 0x1a0   :  { %v993_v10 = vpop.f32.mrf.mxu0  ;;  %v1005_v11 = vpop.f32.mrf.mxu1 }
 0x1a1   :  { %v445_v10 = vpop.permute.xlu0 %444 }
 0x1a2   :  { %v387_v12 = vpop.f32.mrf.mxu0  ;;  %v407_v13 = vpop.f32.mrf.mxu1 }
 0x1a3   :  { %v408_v22 = vadd.f32 %v407_v13, %v283_v15  ;;  %v388_v33 = vadd.f32 %v387_v12, %v263_v32 }
 0x1a4   :  { %v996_v16 = vpop.f32.mrf.mxu0  ;;  %v1008_v17 = vpop.f32.mrf.mxu1 }
 0x1a6   :  { %v392_v19 = vpop.f32.mrf.mxu0  ;;  %v412_v20 = vpop.f32.mrf.mxu1 }
 0x1a7   :  { %v413_v21 = vadd.f32 %v412_v20, %v288_v7  ;;  %v393_v31 = vadd.f32 %v392_v19, %v268_v28  ;;  %v450_v7 = vpop.permute.xlu1 %449  ;;  %v609_v28 = vld [vmem:[%s1614_s7 + $0x30] sm:$0x3] }
 0x1a8   :  { %v999_v23 = vpop.f32.mrf.mxu0  ;;  %v1011_v24 = vpop.f32.mrf.mxu1 }
 0x1a9   :  { %1153 = vtanh.f32 %v413_v21  ;;  %v603_v21 = vld [vmem:[%s1614_s7] sm:$0xff]  ;;  %v604_v23 = vld [vmem:[%s1614_s7 + $0x8] sm:$0xff]  ;;  %v605_v24 = vld [vmem:[%s1614_s7 + $0x10] sm:$0xff] }
 0x1aa   :  { %v397_v27 = vpop.f32.mrf.mxu0  ;;  %1155 = vtanh.f32 %v408_v22 }
 0x1ab   :  { %v398_v29 = vadd.f32 %v397_v27, %v273_v25  ;;  %1157 = vtanh.f32 %v403_v26  ;;  %v440_v12 = vpop.permute.xlu1 %439  ;;  %v606_v25 = vld [vmem:[%s1614_s7 + $0x18] sm:$0xff]  ;;  %v607_v26 = vld [vmem:[%s1614_s7 + $0x20] sm:$0xff]  ;;  %v608_v27 = vld [vmem:[%s1614_s7 + $0x28] sm:$0xff] }
 0x1ac   :  { %v1002_v30 = vpop.f32.mrf.mxu0 }
 0x1ad   :  { %1159 = vtanh.f32 %v398_v29  ;;  %v783_v29 = vld [vmem:[%s1616_s9] sm:$0xff] }
 0x1ae   :  { %1161 = vtanh.f32 %v393_v31 }
 0x1af   :  { %1163 = vtanh.f32 %v388_v33 }
 0x1b0   :  { %1165 = vtanh.f32 %v383_v35 }
 0x1b6   :  { %v1154_v36 = vpop.eup %1153 }
 0x1b7   :  { %1013 = vmatpush3.msk.msra.mxu1 %vm312_vm1, %v1154_v36  ;;  %v1156_v37 = vpop.eup %1155 }
 0x1b8   :  { %1014 = vmatprep.subr.mxu1 %v1220_v14  ;;  %v1158_v38 = vpop.eup %1157 }
 0x1b9   :  { %1015 = vmatpush3.msra.mxu1 %v1156_v37  ;;  %v650_v37 = vpop.permute.xlu0 %649 }
 0x1ba   :  { %1016 = vmatprep.subr.mxu1 %v1220_v14  ;;  %v1160_v39 = vpop.eup %1159 }
 0x1bb   :  { %1017 = vmatpush3.msra.mxu1 %v1158_v38  ;;  %v1162_v40 = vpop.eup %1161 }
 0x1bc   :  { %1018 = vmatprep.subr.mxu1 %v1220_v14  ;;  %v1164_v41 = vpop.eup %1163 }
 0x1bd   :  { %1019 = vmatpush3.msra.mxu1 %v1160_v39  ;;  %v1166_v43 = vpop.eup %1165 }
 0x1be   :  { %1020 = vmatprep.subr.mxu1 %v1220_v14 }
 0x1bf   :  { %1021 = vmatpush3.msra.mxu1 %v1162_v40  ;;  %v645_v40 = vpop.permute.xlu1 %644 }
 0x1c0   :  { %1022 = vmatprep.subr.mxu1 %v1220_v14 }
 0x1c1   :  { %1023 = vmatpush3.msra.mxu1 %v1164_v41 }
 0x1c2   :  { %1024 = vmatprep.subr.mxu1 %v1220_v14 }
 0x1c3   :  { %1025 = vmatpush3.msra.mxu1 %v1166_v43 }
 0x1c4   :  { %1027 = vmatmul.mubr.msk.f32.vlgmr.msra.gmra.mxu1 %vm290_vm2, %v423_v42  ;;  %v640_v42 = vpop.permute.xlu0 %639 }
 0x1c5   :  { %1029 = vmatprep.mubr.msk.f32.mxu1 %vm1221_vm0, %v1220_v14 }
 0x1c8   :  { %1030 = vmatmul.mubr.msk.f32.gmra.mxu1 %vm290_vm2, %v424_v44 }
 0x1c9   :  { %1032 = vmatprep.mubr.msk.f32.mxu1 %vm1221_vm0, %v1220_v14 }
 0x1cc   :  { %1033 = vmatmul.mubr.msk.f32.gmra.mxu1 %vm290_vm2, %v425_v45 }
 0x1cd   :  { %1035 = vmatprep.mubr.msk.f32.mxu1 %vm1221_vm0, %v1220_v14 }
 0x1d0   :  { %1036 = vmatmul.mubr.msk.f32.gmra.mxu1 %vm290_vm2, %v426_v46 }
 0x1d1   :  { %1038 = vmatprep.mubr.msk.f32.mxu1 %vm1221_vm0, %v1220_v14 }
 0x1d4   :  { %1039 = vmatmul.mubr.msk.f32.gmra.mxu1 %vm290_vm2, %v427_v47  ;;  %v635_v47 = vpop.permute.xlu1 %634 }
 0x1d5   :  { %1041 = vmatprep.mubr.msk.f32.mxu1 %vm1221_vm0, %v1220_v14 }
 0x1d8   :  { %1042 = vmatmul.mubr.msk.f32.gmra.mxu1 %vm290_vm2, %v428_v48 }
 0x1d9   :  { %1044 = vmatprep.mubr.msk.f32.mxu1 %vm1221_vm0, %v1220_v14 }
 0x1dc   :  { %1045 = vmatmul.mubr.msk.f32.gmra.mxu1 %vm290_vm2, %v429_v50 }
 0x1dd   :  { %1096 = vmatprep.mubr.msk.f32.mxu1 %vm290_vm2, %v783_v29 }
 0x284   :  { %v562_v51 = vpop.f32.mrf.mxu1 }
 0x285   :  { %v563_v13 = vadd.f32 %v562_v51, %v440_v12  ;;  %v630_v51 = vpop.permute.xlu0 %629 }
 0x286   :  { %v1028_v52 = vpop.f32.mrf.mxu1 }
 0x288   :  { %v567_v53 = vpop.f32.mrf.mxu1 }
 0x289   :  { %v568_v11 = vadd.f32 %v567_v53, %v445_v10 }
 0x28a   :  { %v1031_v54 = vpop.f32.mrf.mxu1 }
 0x28b   :  { %v625_v54 = vpop.permute.xlu1 %624 }
 0x28c   :  { %v572_v56 = vpop.f32.mrf.mxu1 }
 0x28d   :  { %v573_v9 = vadd.f32 %v572_v56, %v450_v7 }
 0x28e   :  { %v1034_v58 = vpop.f32.mrf.mxu1 }
 0x28f   :  { %v620_v58 = vpop.permute.xlu0 %619 }
 0x290   :  { %v577_v59 = vpop.f32.mrf.mxu1 }
 0x291   :  { %v578_v8 = vadd.f32 %v577_v59, %v455_v4  ;;  %v790_v4 = vpop.permute.xlu1 %789 }
 0x292   :  { %v1037_v60 = vpop.f32.mrf.mxu1 }
 0x294   :  { %v582_v63 = vpop.f32.mrf.mxu1 }
 0x295   :  { %v583_v6 = vadd.f32 %v582_v63, %v460_v62 }
 0x296   :  { %v1040_v57 = vpop.f32.mrf.mxu1 }
 0x298   :  { %v587_v55 = vpop.f32.mrf.mxu1 }
 0x299   :  { %v588_v2 = vadd.f32 %v587_v55, %v465_v49 }
 0x29a   :  { %v1043_v0 = vpop.f32.mrf.mxu1 }
 0x29b   :  { %v784_v0 = vld [vmem:[%s1616_s9 + $0x8] sm:$0x1] }
 0x29c   :  { %v592_v1 = vpop.f32.mrf.mxu1 }
 0x29d   :  { %v593_v3 = vadd.f32 %v592_v1, %v470_v61  ;;  %v795_v1 = vpop.permute.xlu0 %794 }
 0x29e   :  { %v1046_v5 = vpop.f32.mrf.mxu1 }
 0x29f   :  { %1167 = vtanh.f32 %v593_v3 }
 0x2a0   :  { %1169 = vtanh.f32 %v588_v2 }
 0x2a1   :  { %1171 = vtanh.f32 %v583_v6 }
 0x2a2   :  { %1173 = vtanh.f32 %v578_v8 }
 0x2a3   :  { %1175 = vtanh.f32 %v573_v9 }
 0x2a4   :  { %1177 = vtanh.f32 %v568_v11 }
 0x2a5   :  { %1179 = vtanh.f32 %v563_v13 }
 0x2ac   :  { %v1168_v15 = vpop.eup %1167 }
 0x2ad   :  { %1048 = vmatpush3.msk.msra.mxu0 %vm312_vm1, %v1168_v15  ;;  %v1170_v16 = vpop.eup %1169 }
 0x2ae   :  { %1049 = vmatprep.subr.mxu0 %v1220_v14  ;;  %v1172_v17 = vpop.eup %1171 }
 0x2af   :  { %1050 = vmatpush3.msra.mxu0 %v1170_v16  ;;  %v1174_v18 = vpop.eup %1173 }
 0x2b0   :  { %1051 = vmatprep.subr.mxu0 %v1220_v14  ;;  %v1176_v19 = vpop.eup %1175 }
 0x2b1   :  { %1052 = vmatpush3.msra.mxu0 %v1172_v17  ;;  %v1178_v20 = vpop.eup %1177 }
 0x2b2   :  { %1053 = vmatprep.subr.mxu0 %v1220_v14  ;;  %v1180_v22 = vpop.eup %1179 }
 0x2b3   :  { %1054 = vmatpush3.msra.mxu0 %v1174_v18 }
 0x2b4   :  { %1055 = vmatprep.subr.mxu0 %v1220_v14 }
 0x2b5   :  { %1056 = vmatpush3.msra.mxu0 %v1176_v19 }
 0x2b6   :  { %1057 = vmatprep.subr.mxu0 %v1220_v14 }
 0x2b7   :  { %1058 = vmatpush3.msra.mxu0 %v1178_v20 }
 0x2b8   :  { %1059 = vmatprep.subr.mxu0 %v1220_v14 }
 0x2b9   :  { %1060 = vmatpush3.msra.mxu0 %v1180_v22 }
 0x2ba   :  { %1062 = vmatmul.mubr.msk.f32.vlgmr.msra.gmra.mxu0 %vm290_vm2, %v603_v21 }
 0x2bb   :  { %1064 = vmatprep.mubr.msk.f32.mxu0 %vm1221_vm0, %v1220_v14 }
 0x2be   :  { %1065 = vmatmul.mubr.msk.f32.gmra.mxu0 %vm290_vm2, %v604_v23 }
 0x2bf   :  { %1067 = vmatprep.mubr.msk.f32.mxu0 %vm1221_vm0, %v1220_v14 }
 0x2c2   :  { %1068 = vmatmul.mubr.msk.f32.gmra.mxu0 %vm290_vm2, %v605_v24 }
 0x2c3   :  { %1070 = vmatprep.mubr.msk.f32.mxu0 %vm1221_vm0, %v1220_v14 }
 0x2c6   :  { %1071 = vmatmul.mubr.msk.f32.gmra.mxu0 %vm290_vm2, %v606_v25 }
 0x2c7   :  { %1073 = vmatprep.mubr.msk.f32.mxu0 %vm1221_vm0, %v1220_v14 }
 0x2ca   :  { %1074 = vmatmul.mubr.msk.f32.gmra.mxu0 %vm290_vm2, %v607_v26 }
 0x2cb   :  { %1076 = vmatprep.mubr.msk.f32.mxu0 %vm1221_vm0, %v1220_v14 }
 0x2ce   :  { %1077 = vmatmul.mubr.msk.f32.gmra.mxu0 %vm290_vm2, %v608_v27 }
 0x2cf   :  { %1079 = vmatprep.mubr.msk.f32.mxu0 %vm1221_vm0, %v1220_v14 }
 0x2d2   :  { %1080 = vmatmul.mubr.msk.f32.gmra.mxu0 %vm290_vm2, %v609_v28 }
 0x37a   :  { %v742_v30 = vpop.f32.mrf.mxu0 }
 0x37b   :  { %v743_v59 = vadd.f32 %v742_v30, %v620_v58 }
 0x37c   :  { %v1063_v31 = vpop.f32.mrf.mxu0 }
 0x37e   :  { %v747_v32 = vpop.f32.mrf.mxu0 }
 0x37f   :  { %v748_v56 = vadd.f32 %v747_v32, %v625_v54 }
 0x380   :  { %v1066_v33 = vpop.f32.mrf.mxu0 }
 0x382   :  { %v752_v34 = vpop.f32.mrf.mxu0 }
 0x383   :  { %v753_v53 = vadd.f32 %v752_v34, %v630_v51 }
 0x384   :  { %v1069_v35 = vpop.f32.mrf.mxu0 }
 0x386   :  { %v757_v36 = vpop.f32.mrf.mxu0 }
 0x387   :  { %v758_v52 = vadd.f32 %v757_v36, %v635_v47 }
 0x388   :  { %v1072_v14 = vpop.f32.mrf.mxu0 }
 0x38a   :  { %v762_v38 = vpop.f32.mrf.mxu0 }
 0x38b   :  { %v763_v50 = vadd.f32 %v762_v38, %v640_v42 }
 0x38c   :  { %v1075_v39 = vpop.f32.mrf.mxu0 }
 0x38e   :  { %v767_v41 = vpop.f32.mrf.mxu0 }
 0x38f   :  { %v768_v45 = vadd.f32 %v767_v41, %v645_v40 }
 0x390   :  { %v1078_v43 = vpop.f32.mrf.mxu0 }
 0x392   :  { %v772_v44 = vpop.f32.mrf.mxu0 }
 0x393   :  { %v773_v46 = vadd.f32 %v772_v44, %v650_v37 }
 0x394   :  { %v1081_v48 = vpop.f32.mrf.mxu0 }
 0x395   :  { %1181 = vtanh.f32 %v773_v46 }
 0x396   :  { %1183 = vtanh.f32 %v768_v45 }
 0x397   :  { %1185 = vtanh.f32 %v763_v50 }
 0x398   :  { %1187 = vtanh.f32 %v758_v52 }
 0x399   :  { %1189 = vtanh.f32 %v753_v53 }
 0x39a   :  { %1191 = vtanh.f32 %v748_v56 }
 0x39b   :  { %1193 = vtanh.f32 %v743_v59 }
 0x3a2   :  { %v1182_v60 = vpop.eup %1181 }
 0x3a3   :  { %1082 = vmatprep.subr.msk.mxu1 %vm312_vm1, %v1182_v60  ;;  %v1184_v61 = vpop.eup %1183 }
 0x3a4   :  { %1083 = vmatpush3.msk.msra.mxu1 %vm312_vm1, %v1182_v60  ;;  %v1186_v63 = vpop.eup %1185 }
 0x3a5   :  { %1084 = vmatprep.subr.mxu1 %v1184_v61  ;;  %v1188_v57 = vpop.eup %1187 }
 0x3a6   :  { %1085 = vmatpush3.msra.mxu1 %v1184_v61  ;;  %v1190_v49 = vpop.eup %1189 }
 0x3a7   :  { %1086 = vmatprep.subr.mxu1 %v1186_v63  ;;  %v1192_v55 = vpop.eup %1191 }
 0x3a8   :  { %1087 = vmatpush3.msra.mxu1 %v1186_v63  ;;  %v1194_v62 = vpop.eup %1193 }
 0x3a9   :  { %1088 = vmatprep.subr.mxu1 %v1188_v57 }
 0x3aa   :  { %1089 = vmatpush3.msra.mxu1 %v1188_v57 }
 0x3ab   :  { %1090 = vmatprep.subr.mxu1 %v1190_v49 }
 0x3ac   :  { %1091 = vmatpush3.msra.mxu1 %v1190_v49 }
 0x3ad   :  { %1092 = vmatprep.subr.mxu1 %v1192_v55 }
 0x3ae   :  { %1093 = vmatpush3.msra.mxu1 %v1192_v55 }
 0x3af   :  { %1094 = vmatprep.subr.mxu1 %v1194_v62 }
 0x3b0   :  { %1095 = vmatpush3.msra.mxu1 %v1194_v62 }
 0x3b1   :  { %1097 = vmatmul.mubr.msk.f32.vlgmr.msra.gmra.mxu1 %vm290_vm2, %v784_v0 }
 0x471   :  { %v1098_v2 = vpop.f32.mrf.mxu1 }
 0x472   :  { %v878_v3 = vadd.f32 %v1098_v2, %v795_v1 }
 0x473   :  { %v872_v5 = vpop.f32.mrf.mxu1 }
 0x474   :  { %882 = vst [vmem:[#allocation2 + $0x8] sm:$0x1] %v878_v3  ;;  %v873_v6 = vadd.f32 %v872_v5, %v790_v4 }
 0x476   :  { %881 = vst [vmem:[#allocation2] sm:$0xff] %v873_v6 }
 0x477   :  { %1206 = shalt.err (!%p1203_p4)
}
 0x478   :  { %s1223_s9 = smov 128   ;;  %s1224_s24 = smov 8  }
 0x479   :  { %894 = dma.vmem_to_hbm [thread:$0]  %s889_s22, 256, %s1618_s11, [#allocation3], %s1223_s9, %s1223_s9, %s1224_s24  }
 0x47a   :  { %1215 = dma.done.wait [#allocation3], 256  }
 0x47b   :  { %1216 = vsyncadd [#allocation3], 4294967040 }
 0x47c   :  { %898 = vsyncpa [#allocation3], 1 }

</bundles_post_ra>
